<compile_context>
chip_gen: v5e
topology: v5e:2x2
jax: 0.10.0
libtpu: 0.0.40
codegen_flags: <defaults>
</compile_context>

<pallas_src>
import functools

import jax
import jax.numpy as jnp
from jax import lax
from jax.experimental import pallas as pl
from jax.experimental.pallas import tpu as pltpu

LEAKY_SLOPE = 0.01          # torch.nn.LeakyReLU default negative_slope
LOGVAR_CLAMP_MAX = 10.0
LANE = 128                  # vreg lane width
TILE_M = 512                # row tile for all kernels
TILE_K = 512                # contraction tile (>=256 keeps the MXU full)
VMEM_LIMIT = 48 * 1024 * 1024   # <= v7x's 64 MiB with headroom


def _round_up(v, m):
    return (v + m - 1) // m * m


# ----------------------------- kernels --------------------------------------

def proj_kernel(x_ref, w_ref, o_ref):
    """Per-row-tile feature projection: o = x @ w (bf16 in, f32 acc, bf16 out)."""
    o_ref[...] = jnp.dot(x_ref[...], w_ref[...],
                         preferred_element_type=jnp.float32).astype(o_ref.dtype)


def gcn_shared_kernel(a_ref, xw_ref, b_ref, w2_ref, o_ref, acc_ref, *, tk):
    """o = LeakyReLU(A @ XW + b1) @ [Wmu | Wlv].

    A streams (tm, tk) tiles; XW is VMEM-resident (full extent) and sliced by
    the contraction index k inside the kernel.
    """
    k = pl.program_id(1)

    @pl.when(k == 0)
    def _():
        acc_ref[...] = jnp.zeros_like(acc_ref)

    kk = pl.multiple_of(k * tk, tk)
    acc_ref[...] += jnp.dot(a_ref[...], xw_ref[pl.ds(kk, tk), :],
                            preferred_element_type=jnp.float32)

    @pl.when(k == pl.num_programs(1) - 1)
    def _():
        h = acc_ref[...] + b_ref[...]
        h = jnp.where(h > 0, h, LEAKY_SLOPE * h)                 # LeakyReLU (f32)
        o_ref[...] = jnp.dot(h.astype(w2_ref.dtype), w2_ref[...],
                             preferred_element_type=jnp.float32).astype(o_ref.dtype)


def gcn_out_kernel(a_ref, hw_ref, b_ref, o_ref, acc_ref, *, tk, latent):
    """o = A @ HW + [bmu | blv], clamp(max=10) on the logvar lanes [latent, 2*latent)."""
    k = pl.program_id(1)

    @pl.when(k == 0)
    def _():
        acc_ref[...] = jnp.zeros_like(acc_ref)

    kk = pl.multiple_of(k * tk, tk)
    acc_ref[...] += jnp.dot(a_ref[...], hw_ref[pl.ds(kk, tk), :],
                            preferred_element_type=jnp.float32)

    @pl.when(k == pl.num_programs(1) - 1)
    def _():
        val = acc_ref[...] + b_ref[...]
        lane = lax.broadcasted_iota(jnp.int32, val.shape, 1)
        is_logvar = (lane >= latent) & (lane < 2 * latent)
        o_ref[...] = jnp.where(is_logvar, jnp.minimum(val, LOGVAR_CLAMP_MAX), val)


# ------------------------- pallas_call wrappers ------------------------------

def _project(x_bf16, w_bf16, tm):
    n_p, cin_p = x_bf16.shape
    hp = w_bf16.shape[1]
    return pl.pallas_call(
        proj_kernel,
        out_shape=jax.ShapeDtypeStruct((n_p, hp), jnp.bfloat16),
        grid_spec=pltpu.PrefetchScalarGridSpec(
            num_scalar_prefetch=0,
            grid=(n_p // tm,),
            in_specs=[pl.BlockSpec((tm, cin_p), lambda i: (i, 0)),
                      pl.BlockSpec((cin_p, hp), lambda i: (0, 0))],
            out_specs=pl.BlockSpec((tm, hp), lambda i: (i, 0)),
        ),
        compiler_params=pltpu.CompilerParams(
            dimension_semantics=("parallel",),
            vmem_limit_bytes=VMEM_LIMIT),
        cost_estimate=pl.CostEstimate(
            flops=2 * n_p * cin_p * hp,
            transcendentals=0,
            bytes_accessed=2 * (n_p * cin_p + cin_p * hp + n_p * hp)),
    )(x_bf16, w_bf16)


def _gcn_shared(a_bf16, xw_bf16, b1_f32, w2_bf16, tm, tk):
    n_p = a_bf16.shape[0]
    hp = xw_bf16.shape[1]
    op = w2_bf16.shape[1]
    kernel = functools.partial(gcn_shared_kernel, tk=tk)
    return pl.pallas_call(
        kernel,
        out_shape=jax.ShapeDtypeStruct((n_p, op), jnp.bfloat16),
        grid_spec=pltpu.PrefetchScalarGridSpec(
            num_scalar_prefetch=0,
            grid=(n_p // tm, n_p // tk),
            in_specs=[pl.BlockSpec((tm, tk), lambda i, k: (i, k)),     # A streamed
                      pl.BlockSpec((n_p, hp), lambda i, k: (0, 0)),    # XW resident
                      pl.BlockSpec((1, hp), lambda i, k: (0, 0)),
                      pl.BlockSpec((hp, op), lambda i, k: (0, 0))],
            out_specs=pl.BlockSpec((tm, op), lambda i, k: (i, 0)),
            scratch_shapes=[pltpu.VMEM((tm, hp), jnp.float32)]),
        compiler_params=pltpu.CompilerParams(
            dimension_semantics=("parallel", "arbitrary"),
            vmem_limit_bytes=VMEM_LIMIT),
        cost_estimate=pl.CostEstimate(
            flops=2 * n_p * n_p * hp + 2 * n_p * hp * op,
            transcendentals=0,
            bytes_accessed=(2 * n_p * n_p          # A streamed once
                            + 2 * n_p * hp         # XW resident, loaded once
                            + 4 * hp
                            + 2 * hp * op
                            + 2 * n_p * op)),
    )(a_bf16, xw_bf16, b1_f32, w2_bf16)


def _gcn_out(a_bf16, hw_bf16, b2_f32, latent, tm, tk):
    n_p = a_bf16.shape[0]
    op = hw_bf16.shape[1]
    kernel = functools.partial(gcn_out_kernel, tk=tk, latent=latent)
    return pl.pallas_call(
        kernel,
        out_shape=jax.ShapeDtypeStruct((n_p, op), jnp.float32),
        grid_spec=pltpu.PrefetchScalarGridSpec(
            num_scalar_prefetch=0,
            grid=(n_p // tm, n_p // tk),
            in_specs=[pl.BlockSpec((tm, tk), lambda i, k: (i, k)),     # A streamed
                      pl.BlockSpec((n_p, op), lambda i, k: (0, 0)),    # HW resident
                      pl.BlockSpec((1, op), lambda i, k: (0, 0))],
            out_specs=pl.BlockSpec((tm, op), lambda i, k: (i, 0)),
            scratch_shapes=[pltpu.VMEM((tm, op), jnp.float32)]),
        compiler_params=pltpu.CompilerParams(
            dimension_semantics=("parallel", "arbitrary"),
            vmem_limit_bytes=VMEM_LIMIT),
        cost_estimate=pl.CostEstimate(
            flops=2 * n_p * n_p * op,
            transcendentals=0,
            bytes_accessed=(2 * n_p * n_p + 2 * n_p * op + 4 * op + 4 * n_p * op)),
    )(a_bf16, hw_bf16, b2_f32)


# ------------------------------- wrapper -------------------------------------

def gcn_norm_adjacency(edge_index, num_nodes, n_pad=None, dtype=jnp.float32):
    """Dense D^{-1/2}(A+I)D^{-1/2}, built directly at the padded shape with the
    output-dtype cast fused into the normalization (single N^2 pass).
    Matches PyG's add_remaining_self_loops: self-loops only for (real) nodes
    that do not already have one.  Padded rows/cols stay identically zero.
    """
    n_pad = num_nodes if n_pad is None else n_pad
    src = edge_index[0]
    dst = edge_index[1]
    # A[i, j] = edge weight j -> i (message flows source -> target)
    a = jnp.zeros((n_pad, n_pad), jnp.float32).at[dst, src].add(1.0)
    idx = jnp.arange(n_pad)
    diag = jnp.diagonal(a)
    need_loop = (idx < num_nodes) & (diag == 0.0)
    a = a.at[idx, idx].add(jnp.where(need_loop, 1.0, 0.0))
    deg = a.sum(axis=1)
    dinv = jnp.where(deg > 0, lax.rsqrt(deg), 0.0)
    return (dinv[:, None] * a * dinv[None, :]).astype(dtype)


def gcn_encoder(x, edge_index, params):
    n, cin = x.shape
    hidden = params["w1"].shape[1]
    latent = params["wmu"].shape[1]

    cin_p = _round_up(cin, LANE)          # lane-dense input width
    hp = _round_up(hidden, LANE)          # lane-dense hidden width
    op = _round_up(2 * latent, LANE)      # lane-dense fused (mu|logvar) width
    tm, tk = TILE_M, TILE_K
    n_p = _round_up(max(n, max(tm, tk)), max(tm, tk))   # padded node count

    # normalized adjacency, built padded + cast in one pass (bf16 for the MXU)
    a_p = gcn_norm_adjacency(edge_index, n, n_p, jnp.bfloat16)

    # node features, padded + cast in one construction
    x_p = jnp.zeros((n_p, cin_p), jnp.bfloat16).at[:n, :cin].set(
        x.astype(jnp.bfloat16))

    # layer-1 weights, lane-padded
    w1_p = (jnp.zeros((cin_p, hp), jnp.float32)
            .at[:cin, :hidden].set(params["w1"]).astype(jnp.bfloat16))
    b1_p = jnp.zeros((1, hp), jnp.float32).at[:, :hidden].set(params["b1"])

    # fused mu/logvar weights: W2 = [Wmu | Wlv], lane- and row-padded
    w2 = jnp.concatenate([params["wmu"], params["wlv"]], axis=1)
    w2_p = (jnp.zeros((hp, op), jnp.float32)
            .at[:hidden, :2 * latent].set(w2).astype(jnp.bfloat16))
    b2 = jnp.concatenate([params["bmu"], params["blv"]], axis=1)
    b2_p = jnp.zeros((1, op), jnp.float32).at[:, :2 * latent].set(b2)

    xw1 = _project(x_p, w1_p, tm)                       # (Np, hp) bf16 : X @ W1
    hw = _gcn_shared(a_p, xw1, b1_p, w2_p, tm, tk)      # (Np, op) bf16 : act(A@XW1+b1) @ W2
    out = _gcn_out(a_p, hw, b2_p, latent, tm, tk)       # (Np, op) f32  : A@HW + b2 (+clamp)

    mu = out[:n, :latent]
    logvar = out[:n, latent:2 * latent]
    return mu, logvar


# ---------------------------- init & reference --------------------------------

def init_params(key, in_channels, hidden_channels, latent_channels):
    k1, k2, k3 = jax.random.split(key, 3)

    def glorot(k, fan_in, fan_out):
        lim = jnp.sqrt(6.0 / (fan_in + fan_out))
        return jax.random.uniform(k, (fan_in, fan_out), jnp.float32, -lim, lim)

    return {
        "w1": glorot(k1, in_channels, hidden_channels),
        "b1": jnp.zeros((1, hidden_channels), jnp.float32),
        "wmu": glorot(k2, hidden_channels, latent_channels),
        "bmu": jnp.zeros((1, latent_channels), jnp.float32),
        "wlv": glorot(k3, hidden_channels, latent_channels),
        "blv": jnp.zeros((1, latent_channels), jnp.float32),
    }


def gcn_encoder_reference(x, edge_index, params):
    """Pure-JAX f32 reference of the PyTorch forward (for tolerance check)."""
    a_hat = gcn_norm_adjacency(edge_index, x.shape[0])
    h = a_hat @ (x @ params["w1"]) + params["b1"]
    h = jnp.where(h > 0, h, LEAKY_SLOPE * h)
    mu = a_hat @ (h @ params["wmu"]) + params["bmu"]
    lv = a_hat @ (h @ params["wlv"]) + params["blv"]
    return mu, jnp.minimum(lv, LOGVAR_CLAMP_MAX)


if __name__ == "__main__":
    num_nodes = 8
    in_channels = 4
    hidden_channels = 32
    latent_channels = 16

    key = jax.random.PRNGKey(0)
    kx, kp = jax.random.split(key)

    x = jax.random.normal(kx, (num_nodes, in_channels), jnp.float32)
    # small deterministic directed ring graph (plus reverse edges)
    src = jnp.arange(num_nodes, dtype=jnp.int32)
    dst = (src + 1) % num_nodes
    edge_index = jnp.stack([jnp.concatenate([src, dst]),
                            jnp.concatenate([dst, src])], axis=0)

    params = init_params(kp, in_channels, hidden_channels, latent_channels)

    mu, logvar = gcn_encoder(x, edge_index, params)
    jax.block_until_ready((mu, logvar))

    assert mu.shape == (num_nodes, latent_channels)
    assert logvar.shape == (num_nodes, latent_channels)
    assert bool(jnp.all(logvar <= LOGVAR_CLAMP_MAX))

    mu_ref, lv_ref = gcn_encoder_reference(x, edge_index, params)
    assert bool(jnp.allclose(mu, mu_ref, atol=5e-2, rtol=5e-2))
    assert bool(jnp.allclose(logvar, lv_ref, atol=5e-2, rtol=5e-2))

    print("KERNEL_OK")
</pallas_src>

<mosaic_0001>
module attributes {stable_mosaic.version = 11 : i64} {
  func.func @proj_kernel(%arg0: i32, %arg1: memref<512x128xbf16, #tpu.memory_space<vmem>>, %arg2: memref<128x128xbf16, #tpu.memory_space<vmem>>, %arg3: memref<512x128xbf16, #tpu.memory_space<vmem>>) attributes {dimension_semantics = [#tpu.dimension_semantics<parallel>], iteration_bounds = array<i64: 1>, scalar_prefetch = 0 : i64, scratch_operands = 0 : i64, tpu.core_type = #tpu.core_type<tc>, window_params = [{transform_indices = @transform_0, window_bounds = array<i64: 512, 128>}, {pipeline_mode = #tpu.pipeline_mode<synchronous>, transform_indices = @transform_1, window_bounds = array<i64: 128, 128>}, {transform_indices = @transform_2, window_bounds = array<i64: 512, 128>}]} {
    %c0 = arith.constant 0 : index
    %c0_0 = arith.constant 0 : index
    %0 = vector.load %arg1[%c0, %c0_0] : memref<512x128xbf16, #tpu.memory_space<vmem>>, vector<512x128xbf16>
    %c0_1 = arith.constant 0 : index
    %c0_2 = arith.constant 0 : index
    %1 = vector.load %arg2[%c0_1, %c0_2] : memref<128x128xbf16, #tpu.memory_space<vmem>>, vector<128x128xbf16>
    %cst = arith.constant dense<0.000000e+00> : vector<512x128xf32>
    %2 = tpu.matmul %0, %1, %cst {dimension_numbers = #tpu.dot_dimension_numbers<[1], [0], [0], [1], [0, 0, 1, 1], [], []>} : vector<512x128xbf16>, vector<128x128xbf16>, vector<512x128xf32> -> vector<512x128xf32>
    %3 = arith.truncf %2 : vector<512x128xf32> to vector<512x128xbf16>
    %c0_3 = arith.constant 0 : index
    %c0_4 = arith.constant 0 : index
    %4 = vector.load %arg3[%c0_3, %c0_4] : memref<512x128xbf16, #tpu.memory_space<vmem>>, vector<512x128xbf16>
    tpu.vector_store %arg3[%c0_3, %c0_4], %3 {strides = array<i32>} : memref<512x128xbf16, #tpu.memory_space<vmem>>, vector<512x128xbf16>,
    return
  }
  func.func @transform_0(%arg0: i32) -> (i32, i32) {
    %c0_i32 = arith.constant 0 : i32
    %c0_i32_0 = arith.constant 0 : i32
    return %arg0, %c0_i32 : i32, i32
  }
  func.func @transform_1(%arg0: i32) -> (i32, i32) {
    %c0_i32 = arith.constant 0 : i32
    %c0_i32_0 = arith.constant 0 : i32
    %c0_i32_1 = arith.constant 0 : i32
    return %c0_i32, %c0_i32_0 : i32, i32
  }
  func.func @transform_2(%arg0: i32) -> (i32, i32) {
    %c0_i32 = arith.constant 0 : i32
    %c0_i32_0 = arith.constant 0 : i32
    return %arg0, %c0_i32 : i32, i32
  }
}

</mosaic_0001>

<bundles_post_ra>
// kernel: tpu_custom_call.1
= control target key start
LH: loop header
LB: loop body
LE: loop exit
PB: predicated region body
PF: predicated region fallthrough
CT: control target
= control target key end

     0   :  { %7 = vsyncpa [#allocation3], 0  ;;  %s1217_s0 = inlined_call_operand.hbm [shape: bf16[512,128], index: 0, kind: input, shape index: {}]   ;;  %s1218_s1 = inlined_call_operand.hbm [shape: bf16[128,128], index: 1, kind: input, shape index: {}]   ;;  %s1219_s2 = inlined_call_operand.hbm [shape: bf16[512,128], index: 2, kind: output, shape index: {}]  }
   0x1   :  { %8 = vsyncpa [#allocation6], 0 }
   0x2   :  { %9 = vsyncpa [#allocation4], 0  ;;  %s14_s11 = sshll.u32 %s1217_s0, 4  ;;  %s1179_s12 = smov [#allocation2]   ;;  %s15_s11 = int_to_ptr.hbm [resolvable:$true] %s14_s11 }
   0x3   :  { %s16_s13 = sshll.u32 %s1179_s12, 4  ;;  %s27_s16 = sshll.u32 %s1218_s1, 4  ;;  %s17_s13 = int_to_ptr.vmem [resolvable:$true] %s16_s13  ;;  %s28_s16 = int_to_ptr.hbm [resolvable:$true] %s27_s16 }
   0x4   :  { %s1180_s17 = smov 64   ;;  %s1181_s18 = smov 4  }
   0x5   :  { %22 = dma.hbm_to_vmem [thread:$0]  %s15_s11, 4096, %s17_s13, [#allocation3], %s1180_s17, %s1180_s17, %s1181_s18  }
   0x6   :  { %s1182_s19 = smov [#allocation5]  }
   0x7   :  { %s29_s20 = sshll.u32 %s1182_s19, 4  ;;  %s30_s20 = int_to_ptr.vmem [resolvable:$true] %s29_s20 }
   0x8   :  { %35 = dma.hbm_to_vmem [thread:$0]  %s28_s16, 1024, %s30_s20, [#allocation6], %s1180_s17, %s1180_s17, %s1181_s18  }
   0x9   :  { %1173 = dma.done.wait [#allocation3], 4096  }
   0xa   :  { %1174 = vsyncadd [#allocation3], 4294963200 }
   0xb   :  { %1175 = dma.done.wait [#allocation6], 1024  }
   0xc   :  { %1176 = vsyncadd [#allocation6], 4294966272  ;;  %v880_v0 = vld [vmem:[#allocation5 + $0x38] sm:$0xff]  ;;  %v879_v1 = vld [vmem:[#allocation5 + $0x30] sm:$0xff]  ;;  %s1183_s0 = smov [#allocation7]   ;;  %s667_s23 = sshll.u32 %s1219_s2, 4  ;;  %s668_s23 = int_to_ptr.hbm [resolvable:$true] %s667_s23 }
   0xd   :  { %364 = vmatpush.bf16.msra.mxu0 %v880_v0  ;;  %1072 = vmatpush.bf16.msra.mxu1 %v880_v0  ;;  %v878_v2 = vld [vmem:[#allocation5 + $0x28] sm:$0xff]  ;;  %v877_v3 = vld [vmem:[#allocation5 + $0x20] sm:$0xff]  ;;  %v876_v4 = vld [vmem:[#allocation5 + $0x18] sm:$0xff]  ;;  %s665_s1 = sshll.u32 %s1183_s0, 4  ;;  %s666_s1 = int_to_ptr.vmem [resolvable:$true] %s665_s1 }
   0xe   :  { %1073 = vmatpush.bf16.msra.mxu2 %v880_v0  ;;  %1074 = vmatpush.bf16.msra.mxu3 %v880_v0  ;;  %v875_v5 = vld [vmem:[#allocation5 + $0x10] sm:$0xff]  ;;  %v874_v6 = vld [vmem:[#allocation5 + $0x8] sm:$0xff]  ;;  %v873_v7 = vld [vmem:[#allocation5] sm:$0xff] }
   0xf   :  { %v841_v8 = vld [vmem:[#allocation2] sm:$0xff]  ;;  %v842_v12 = vld [vmem:[#allocation2 + $0x8] sm:$0xff]  ;;  %v843_v16 = vld [vmem:[#allocation2 + $0x10] sm:$0xff] }
  0x10   :  { %v849_v9 = vld [vmem:[#allocation2 + $0x40] sm:$0xff]  ;;  %v850_v13 = vld [vmem:[#allocation2 + $0x48] sm:$0xff]  ;;  %v851_v17 = vld [vmem:[#allocation2 + $0x50] sm:$0xff] }
  0x11   :  { %365 = vmatpush.bf16.msra.mxu0 %v879_v1  ;;  %1075 = vmatpush.bf16.msra.mxu1 %v879_v1  ;;  %v857_v10 = vld [vmem:[#allocation2 + $0x80] sm:$0xff]  ;;  %v858_v14 = vld [vmem:[#allocation2 + $0x88] sm:$0xff]  ;;  %v859_v18 = vld [vmem:[#allocation2 + $0x90] sm:$0xff] }
  0x12   :  { %1076 = vmatpush.bf16.msra.mxu2 %v879_v1  ;;  %1077 = vmatpush.bf16.msra.mxu3 %v879_v1  ;;  %v865_v11 = vld [vmem:[#allocation2 + $0xc0] sm:$0xff]  ;;  %v866_v15 = vld [vmem:[#allocation2 + $0xc8] sm:$0xff]  ;;  %v867_v19 = vld [vmem:[#allocation2 + $0xd0] sm:$0xff] }
  0x13   :  { %v844_v20 = vld [vmem:[#allocation2 + $0x18] sm:$0xff]  ;;  %v845_v24 = vld [vmem:[#allocation2 + $0x20] sm:$0xff]  ;;  %v846_v28 = vld [vmem:[#allocation2 + $0x28] sm:$0xff] }
  0x14   :  { %v852_v21 = vld [vmem:[#allocation2 + $0x58] sm:$0xff]  ;;  %v853_v25 = vld [vmem:[#allocation2 + $0x60] sm:$0xff]  ;;  %v854_v29 = vld [vmem:[#allocation2 + $0x68] sm:$0xff] }
  0x15   :  { %366 = vmatpush.bf16.msra.mxu0 %v878_v2  ;;  %1078 = vmatpush.bf16.msra.mxu1 %v878_v2  ;;  %v860_v22 = vld [vmem:[#allocation2 + $0x98] sm:$0xff]  ;;  %v861_v26 = vld [vmem:[#allocation2 + $0xa0] sm:$0xff]  ;;  %v862_v30 = vld [vmem:[#allocation2 + $0xa8] sm:$0xff] }
  0x16   :  { %1079 = vmatpush.bf16.msra.mxu2 %v878_v2  ;;  %1080 = vmatpush.bf16.msra.mxu3 %v878_v2  ;;  %v868_v23 = vld [vmem:[#allocation2 + $0xd8] sm:$0xff]  ;;  %v869_v27 = vld [vmem:[#allocation2 + $0xe0] sm:$0xff]  ;;  %v870_v31 = vld [vmem:[#allocation2 + $0xe8] sm:$0xff] }
  0x17   :  { %v847_v32 = vld [vmem:[#allocation2 + $0x30] sm:$0xff]  ;;  %v848_v36 = vld [vmem:[#allocation2 + $0x38] sm:$0xff] }
  0x18   :  { %v855_v33 = vld [vmem:[#allocation2 + $0x70] sm:$0xff]  ;;  %v856_v37 = vld [vmem:[#allocation2 + $0x78] sm:$0xff] }
  0x19   :  { %367 = vmatpush.bf16.msra.mxu0 %v877_v3  ;;  %1081 = vmatpush.bf16.msra.mxu1 %v877_v3  ;;  %v863_v34 = vld [vmem:[#allocation2 + $0xb0] sm:$0xff]  ;;  %v864_v38 = vld [vmem:[#allocation2 + $0xb8] sm:$0xff] }
  0x1a   :  { %1082 = vmatpush.bf16.msra.mxu2 %v877_v3  ;;  %1083 = vmatpush.bf16.msra.mxu3 %v877_v3  ;;  %v871_v35 = vld [vmem:[#allocation2 + $0xf0] sm:$0xff]  ;;  %v872_v39 = vld [vmem:[#allocation2 + $0xf8] sm:$0xff] }
  0x1d   :  { %368 = vmatpush.bf16.msra.mxu0 %v876_v4  ;;  %1084 = vmatpush.bf16.msra.mxu1 %v876_v4 }
  0x1e   :  { %1085 = vmatpush.bf16.msra.mxu2 %v876_v4  ;;  %1086 = vmatpush.bf16.msra.mxu3 %v876_v4 }
  0x21   :  { %369 = vmatpush.bf16.msra.mxu0 %v875_v5  ;;  %1087 = vmatpush.bf16.msra.mxu1 %v875_v5 }
  0x22   :  { %1088 = vmatpush.bf16.msra.mxu2 %v875_v5  ;;  %1089 = vmatpush.bf16.msra.mxu3 %v875_v5 }
  0x25   :  { %370 = vmatpush.bf16.msra.mxu0 %v874_v6  ;;  %1090 = vmatpush.bf16.msra.mxu1 %v874_v6 }
  0x26   :  { %1091 = vmatpush.bf16.msra.mxu2 %v874_v6  ;;  %1092 = vmatpush.bf16.msra.mxu3 %v874_v6 }
  0x29   :  { %371 = vmatpush.bf16.msra.mxu0 %v873_v7  ;;  %1093 = vmatpush.bf16.msra.mxu1 %v873_v7 }
  0x2a   :  { %1094 = vmatpush.bf16.msra.mxu2 %v873_v7  ;;  %1095 = vmatpush.bf16.msra.mxu3 %v873_v7 }
  0x2c   :  { %372 = vmatmul.bf16.vlgmr.msra.gmra.mxu0 %v841_v8  ;;  %412 = vmatmul.bf16.vlgmr.msra.gmra.mxu1 %v849_v9 }
  0x2d   :  { %452 = vmatmul.bf16.vlgmr.msra.gmra.mxu2 %v857_v10  ;;  %492 = vmatmul.bf16.vlgmr.msra.gmra.mxu3 %v865_v11 }
  0x3c   :  { %377 = vmatmul.bf16.gmra.mxu0 %v842_v12  ;;  %417 = vmatmul.bf16.gmra.mxu1 %v850_v13 }
  0x3d   :  { %457 = vmatmul.bf16.gmra.mxu2 %v858_v14  ;;  %497 = vmatmul.bf16.gmra.mxu3 %v866_v15 }
  0x4c   :  { %382 = vmatmul.bf16.gmra.mxu0 %v843_v16  ;;  %422 = vmatmul.bf16.gmra.mxu1 %v851_v17 }
  0x4d   :  { %462 = vmatmul.bf16.gmra.mxu2 %v859_v18  ;;  %502 = vmatmul.bf16.gmra.mxu3 %v867_v19 }
  0x5c   :  { %387 = vmatmul.bf16.gmra.mxu0 %v844_v20  ;;  %427 = vmatmul.bf16.gmra.mxu1 %v852_v21 }
  0x5d   :  { %467 = vmatmul.bf16.gmra.mxu2 %v860_v22  ;;  %507 = vmatmul.bf16.gmra.mxu3 %v868_v23 }
  0x6c   :  { %392 = vmatmul.bf16.gmra.mxu0 %v845_v24  ;;  %432 = vmatmul.bf16.gmra.mxu1 %v853_v25 }
  0x6d   :  { %472 = vmatmul.bf16.gmra.mxu2 %v861_v26  ;;  %512 = vmatmul.bf16.gmra.mxu3 %v869_v27 }
  0x7c   :  { %397 = vmatmul.bf16.gmra.mxu0 %v846_v28  ;;  %437 = vmatmul.bf16.gmra.mxu1 %v854_v29 }
  0x7d   :  { %477 = vmatmul.bf16.gmra.mxu2 %v862_v30  ;;  %517 = vmatmul.bf16.gmra.mxu3 %v870_v31 }
  0x8c   :  { %402 = vmatmul.bf16.gmra.mxu0 %v847_v32  ;;  %442 = vmatmul.bf16.gmra.mxu1 %v855_v33 }
  0x8d   :  { %482 = vmatmul.bf16.gmra.mxu2 %v863_v34  ;;  %522 = vmatmul.bf16.gmra.mxu3 %v871_v35 }
  0x9c   :  { %407 = vmatmul.bf16.gmra.mxu0 %v848_v36  ;;  %447 = vmatmul.bf16.gmra.mxu1 %v856_v37 }
  0x9d   :  { %487 = vmatmul.bf16.gmra.mxu2 %v864_v38  ;;  %527 = vmatmul.bf16.gmra.mxu3 %v872_v39 }
  0xa9   :  { %v373_v40 = vpop.f32.mrf.mxu0  ;;  %v413_v41 = vpop.f32.mrf.mxu1 }
  0xb0   :  { %v453_v42 = vpop.f32.mrf.mxu2  ;;  %v493_v43 = vpop.f32.mrf.mxu3 }
  0xb1   :  { %v375_v44 = vpop.f32.mrf.mxu0  ;;  %v415_v45 = vpop.f32.mrf.mxu1 }
  0xb2   :  { %v884_v46 = vpack.c.bf16 %v375_v44, %v373_v40  ;;  %v924_v47 = vpack.c.bf16 %v415_v45, %v413_v41 }
  0xb4   :  { %885 = vst [vmem:[#allocation7] sm:$0xff] %v884_v46  }
  0xb5   :  { %1048 = vst [vmem:[#allocation7 + $0x40] sm:$0xff] %v924_v47  }
  0xb8   :  { %v455_v48 = vpop.f32.mrf.mxu2  ;;  %v495_v49 = vpop.f32.mrf.mxu3 }
  0xb9   :  { %v964_v50 = vpack.c.bf16 %v455_v48, %v453_v42  ;;  %v1004_v51 = vpack.c.bf16 %v495_v49, %v493_v43  ;;  %v378_v52 = vpop.f32.mrf.mxu0  ;;  %v418_v53 = vpop.f32.mrf.mxu1 }
  0xbb   :  { %1056 = vst [vmem:[#allocation7 + $0x80] sm:$0xff] %v964_v50  }
  0xbc   :  { %1064 = vst [vmem:[#allocation7 + $0xc0] sm:$0xff] %v1004_v51  }
  0xc0   :  { %v458_v54 = vpop.f32.mrf.mxu2  ;;  %v498_v55 = vpop.f32.mrf.mxu3 }
  0xc1   :  { %v380_v56 = vpop.f32.mrf.mxu0  ;;  %v420_v57 = vpop.f32.mrf.mxu1 }
  0xc2   :  { %v889_v58 = vpack.c.bf16 %v380_v56, %v378_v52  ;;  %v929_v59 = vpack.c.bf16 %v420_v57, %v418_v53 }
  0xc4   :  { %1041 = vst [vmem:[#allocation7 + $0x8] sm:$0xff] %v889_v58  }
  0xc5   :  { %1049 = vst [vmem:[#allocation7 + $0x48] sm:$0xff] %v929_v59  }
  0xc8   :  { %v460_v60 = vpop.f32.mrf.mxu2  ;;  %v500_v61 = vpop.f32.mrf.mxu3 }
  0xc9   :  { %v969_v62 = vpack.c.bf16 %v460_v60, %v458_v54  ;;  %v1009_v63 = vpack.c.bf16 %v500_v61, %v498_v55  ;;  %v383_v0 = vpop.f32.mrf.mxu0  ;;  %v423_v1 = vpop.f32.mrf.mxu1 }
  0xcb   :  { %1057 = vst [vmem:[#allocation7 + $0x88] sm:$0xff] %v969_v62  }
  0xcc   :  { %1065 = vst [vmem:[#allocation7 + $0xc8] sm:$0xff] %v1009_v63  }
  0xd0   :  { %v463_v2 = vpop.f32.mrf.mxu2  ;;  %v503_v3 = vpop.f32.mrf.mxu3 }
  0xd1   :  { %v385_v4 = vpop.f32.mrf.mxu0  ;;  %v425_v5 = vpop.f32.mrf.mxu1 }
  0xd2   :  { %v894_v6 = vpack.c.bf16 %v385_v4, %v383_v0  ;;  %v934_v7 = vpack.c.bf16 %v425_v5, %v423_v1 }
  0xd4   :  { %1042 = vst [vmem:[#allocation7 + $0x10] sm:$0xff] %v894_v6  }
  0xd5   :  { %1050 = vst [vmem:[#allocation7 + $0x50] sm:$0xff] %v934_v7  }
  0xd8   :  { %v465_v8 = vpop.f32.mrf.mxu2  ;;  %v505_v9 = vpop.f32.mrf.mxu3 }
  0xd9   :  { %v974_v10 = vpack.c.bf16 %v465_v8, %v463_v2  ;;  %v1014_v11 = vpack.c.bf16 %v505_v9, %v503_v3  ;;  %v388_v12 = vpop.f32.mrf.mxu0  ;;  %v428_v13 = vpop.f32.mrf.mxu1 }
  0xdb   :  { %1058 = vst [vmem:[#allocation7 + $0x90] sm:$0xff] %v974_v10  }
  0xdc   :  { %1066 = vst [vmem:[#allocation7 + $0xd0] sm:$0xff] %v1014_v11  }
  0xe0   :  { %v468_v14 = vpop.f32.mrf.mxu2  ;;  %v508_v15 = vpop.f32.mrf.mxu3 }
  0xe1   :  { %v390_v16 = vpop.f32.mrf.mxu0  ;;  %v430_v17 = vpop.f32.mrf.mxu1 }
  0xe2   :  { %v899_v18 = vpack.c.bf16 %v390_v16, %v388_v12  ;;  %v939_v19 = vpack.c.bf16 %v430_v17, %v428_v13 }
  0xe4   :  { %1043 = vst [vmem:[#allocation7 + $0x18] sm:$0xff] %v899_v18  }
  0xe5   :  { %1051 = vst [vmem:[#allocation7 + $0x58] sm:$0xff] %v939_v19  }
  0xe8   :  { %v470_v20 = vpop.f32.mrf.mxu2  ;;  %v510_v21 = vpop.f32.mrf.mxu3 }
  0xe9   :  { %v979_v22 = vpack.c.bf16 %v470_v20, %v468_v14  ;;  %v1019_v23 = vpack.c.bf16 %v510_v21, %v508_v15  ;;  %v393_v24 = vpop.f32.mrf.mxu0  ;;  %v433_v25 = vpop.f32.mrf.mxu1 }
  0xeb   :  { %1059 = vst [vmem:[#allocation7 + $0x98] sm:$0xff] %v979_v22  }
  0xec   :  { %1067 = vst [vmem:[#allocation7 + $0xd8] sm:$0xff] %v1019_v23  }
  0xf0   :  { %v473_v26 = vpop.f32.mrf.mxu2  ;;  %v513_v27 = vpop.f32.mrf.mxu3 }
  0xf1   :  { %v395_v28 = vpop.f32.mrf.mxu0  ;;  %v435_v29 = vpop.f32.mrf.mxu1 }
  0xf2   :  { %v904_v30 = vpack.c.bf16 %v395_v28, %v393_v24  ;;  %v944_v31 = vpack.c.bf16 %v435_v29, %v433_v25 }
  0xf4   :  { %1044 = vst [vmem:[#allocation7 + $0x20] sm:$0xff] %v904_v30  }
  0xf5   :  { %1052 = vst [vmem:[#allocation7 + $0x60] sm:$0xff] %v944_v31  }
  0xf8   :  { %v475_v32 = vpop.f32.mrf.mxu2  ;;  %v515_v33 = vpop.f32.mrf.mxu3 }
  0xf9   :  { %v984_v34 = vpack.c.bf16 %v475_v32, %v473_v26  ;;  %v1024_v35 = vpack.c.bf16 %v515_v33, %v513_v27  ;;  %v398_v36 = vpop.f32.mrf.mxu0  ;;  %v438_v37 = vpop.f32.mrf.mxu1 }
  0xfb   :  { %1060 = vst [vmem:[#allocation7 + $0xa0] sm:$0xff] %v984_v34  }
  0xfc   :  { %1068 = vst [vmem:[#allocation7 + $0xe0] sm:$0xff] %v1024_v35  }
 0x100   :  { %v478_v38 = vpop.f32.mrf.mxu2  ;;  %v518_v39 = vpop.f32.mrf.mxu3 }
 0x101   :  { %v400_v40 = vpop.f32.mrf.mxu0  ;;  %v440_v41 = vpop.f32.mrf.mxu1 }
 0x102   :  { %v909_v42 = vpack.c.bf16 %v400_v40, %v398_v36  ;;  %v949_v43 = vpack.c.bf16 %v440_v41, %v438_v37 }
 0x104   :  { %1045 = vst [vmem:[#allocation7 + $0x28] sm:$0xff] %v909_v42  }
 0x105   :  { %1053 = vst [vmem:[#allocation7 + $0x68] sm:$0xff] %v949_v43  }
 0x108   :  { %v480_v44 = vpop.f32.mrf.mxu2  ;;  %v520_v45 = vpop.f32.mrf.mxu3 }
 0x109   :  { %v989_v46 = vpack.c.bf16 %v480_v44, %v478_v38  ;;  %v1029_v47 = vpack.c.bf16 %v520_v45, %v518_v39  ;;  %v403_v48 = vpop.f32.mrf.mxu0  ;;  %v443_v49 = vpop.f32.mrf.mxu1 }
 0x10b   :  { %1061 = vst [vmem:[#allocation7 + $0xa8] sm:$0xff] %v989_v46  }
 0x10c   :  { %1069 = vst [vmem:[#allocation7 + $0xe8] sm:$0xff] %v1029_v47  }
 0x110   :  { %v483_v50 = vpop.f32.mrf.mxu2  ;;  %v523_v51 = vpop.f32.mrf.mxu3 }
 0x111   :  { %v405_v52 = vpop.f32.mrf.mxu0  ;;  %v445_v53 = vpop.f32.mrf.mxu1 }
 0x112   :  { %v914_v54 = vpack.c.bf16 %v405_v52, %v403_v48  ;;  %v954_v55 = vpack.c.bf16 %v445_v53, %v443_v49 }
 0x114   :  { %1046 = vst [vmem:[#allocation7 + $0x30] sm:$0xff] %v914_v54  }
 0x115   :  { %1054 = vst [vmem:[#allocation7 + $0x70] sm:$0xff] %v954_v55  }
 0x118   :  { %v485_v56 = vpop.f32.mrf.mxu2  ;;  %v525_v57 = vpop.f32.mrf.mxu3 }
 0x119   :  { %v994_v58 = vpack.c.bf16 %v485_v56, %v483_v50  ;;  %v1034_v59 = vpack.c.bf16 %v525_v57, %v523_v51  ;;  %v408_v60 = vpop.f32.mrf.mxu0  ;;  %v448_v61 = vpop.f32.mrf.mxu1 }
 0x11b   :  { %1062 = vst [vmem:[#allocation7 + $0xb0] sm:$0xff] %v994_v58  }
 0x11c   :  { %1070 = vst [vmem:[#allocation7 + $0xf0] sm:$0xff] %v1034_v59  }
 0x120   :  { %v488_v62 = vpop.f32.mrf.mxu2  ;;  %v528_v63 = vpop.f32.mrf.mxu3 }
 0x121   :  { %v410_v0 = vpop.f32.mrf.mxu0  ;;  %v450_v1 = vpop.f32.mrf.mxu1 }
 0x122   :  { %v919_v2 = vpack.c.bf16 %v410_v0, %v408_v60  ;;  %v959_v3 = vpack.c.bf16 %v450_v1, %v448_v61 }
 0x124   :  { %1047 = vst [vmem:[#allocation7 + $0x38] sm:$0xff] %v919_v2  }
 0x125   :  { %1055 = vst [vmem:[#allocation7 + $0x78] sm:$0xff] %v959_v3  }
 0x128   :  { %v490_v4 = vpop.f32.mrf.mxu2  ;;  %v530_v5 = vpop.f32.mrf.mxu3 }
 0x129   :  { %v999_v6 = vpack.c.bf16 %v490_v4, %v488_v62  ;;  %v1039_v7 = vpack.c.bf16 %v530_v5, %v528_v63 }
 0x12b   :  { %1063 = vst [vmem:[#allocation7 + $0xb8] sm:$0xff] %v999_v6  }
 0x12c   :  { %1071 = vst [vmem:[#allocation7 + $0xf8] sm:$0xff] %v1039_v7  }
 0x12d   :  { %673 = dma.vmem_to_hbm [thread:$0]  %s666_s1, 4096, %s668_s23, [#allocation4], %s1180_s17, %s1180_s17, %s1181_s18  }
 0x12e   :  { %1177 = dma.done.wait [#allocation4], 4096  }
 0x12f   :  { %1178 = vsyncadd [#allocation4], 4294963200 }
 0x130   :  { %678 = vsyncpa [#allocation3], 1 }
 0x131   :  { %679 = vsyncpa [#allocation6], 1 }
 0x132   :  { %680 = vsyncpa [#allocation4], 1 }

</bundles_post_ra>
